<compile_context>
chip_gen: v7x
topology: tpu7x:2x2x1
jax: 0.10.0
libtpu: 0.0.40
codegen_flags: <defaults>
</compile_context>

<pallas_src>
import functools

import jax
import jax.numpy as jnp
from jax.experimental import pallas as pl
from jax.experimental.pallas import tpu as pltpu

_LANE = 128


def _pair(v):
    if isinstance(v, (tuple, list)):
        return int(v[0]), int(v[1])
    return int(v), int(v)


def _chip_info():
    """Returns (two_tensorcores, input_tile_budget_bytes, vmem_capacity_bytes)."""
    try:
        kind = jax.devices()[0].device_kind.lower()
    except Exception:
        kind = ""
    is_v7 = "v7" in kind
    two_cores = is_v7 or ("v4" in kind)          # chips with 2 TCs behind 1 device
    budget = (4 << 20) if is_v7 else (8 << 20)   # per-step input tile target
    vmem_cap = (64 << 20) if is_v7 else (128 << 20)
    try:
        vmem_cap = int(pltpu.get_tpu_info().vmem_capacity_bytes)
    except Exception:
        pass
    return two_cores, budget, vmem_cap


def _avgpool2d_kernel(x_ref, o_ref, *, kh, kw, sh, sw, out_h, out_w):
    # x_ref: (sh, sw, Hb, Wb, TC)  phase-decomposed input, channels in lanes.
    # o_ref: (out_h, out_w, TC)
    # Tap (ki,kj) of output (i,j) reads input row i*sh+ki = (i + ki//sh)*sh + ki%sh
    # -> phase (ki%sh, kj%sw) and a contiguous unit-stride slice of length
    #    out_h/out_w starting at (ki//sh, kj//sw). No strided access.
    taps = []
    for ki in range(kh):
        for kj in range(kw):
            taps.append(
                x_ref[ki % sh, kj % sw,
                      pl.ds(ki // sh, out_h),
                      pl.ds(kj // sw, out_w), :].astype(jnp.float32))
    # Pairwise tree-sum (log-depth, no accumulator-ref RMW chain).
    while len(taps) > 1:
        nxt = [taps[i] + taps[i + 1] for i in range(0, len(taps) - 1, 2)]
        if len(taps) % 2:
            nxt.append(taps[-1])
        taps = nxt
    o_ref[...] = (taps[0] * (1.0 / float(kh * kw))).astype(o_ref.dtype)


def avg_pool2d_pallas(x, kernel_size, stride=None, padding=0):
    """nn.AvgPool2d(kernel_size, stride, padding) on NCHW input.

    count_include_pad=True, ceil_mode=False (PyTorch defaults; AvgPool3d in the
    rule3 transform also uses its defaults).
    """
    kh, kw = _pair(kernel_size)
    sh, sw = (kh, kw) if stride is None else _pair(stride)
    ph, pw = _pair(padding)

    N, C, H, W = x.shape
    NC = N * C
    out_h = (H + 2 * ph - kh) // sh + 1
    out_w = (W + 2 * pw - kw) // sw + 1
    itemsize = jnp.dtype(x.dtype).itemsize

    two_cores, budget, vmem_cap = _chip_info()

    # Rounded-up padded extents so the (Hb, sh)/(Wb, sw) phase reshape fits;
    # extra rows/cols are zero and never read by the kernel.
    Hb = max(-(-(H + 2 * ph) // sh), (kh - 1) // sh + out_h)
    Wb = max(-(-(W + 2 * pw) // sw), (kw - 1) // sw + out_w)
    # Optional sublane (8-) alignment of Wb, only when the extra staged HBM
    # traffic is small (<= ~14%) -- this kernel is HBM-bound.
    Wb_pad = -(-Wb // 8) * 8
    if Wb_pad != Wb and (Wb_pad - Wb) * 7 <= Wb:
        Wb = Wb_pad
    Hpp, Wpp = Hb * sh, Wb * sw

    # ---- channel tile selection ---------------------------------------------
    plane_bytes = Hpp * Wpp * itemsize
    nc_up = -(-NC // _LANE) * _LANE
    tc = max(_LANE, (budget // max(plane_bytes, 1)) // _LANE * _LANE)
    TC = min(tc, nc_up)
    # 2-way channel split only on chips that actually have 2 TensorCores.
    if two_cores and TC >= nc_up and nc_up >= 2 * _LANE:
        TC = max(_LANE, (nc_up // 2) // _LANE * _LANE)
    NCp = -(-NC // TC) * TC
    G = NCp // TC
    grid = (G,)

    # ---- single pad + single transpose staging pass -------------------------
    # (NC,H,W) -pad-> (NCp,Hpp,Wpp) -free reshape-> (G,TC,Hb,sh,Wb,sw)
    # -ONE transpose-> (G, sh, sw, Hb, Wb, TC): channel-block-major, so every
    # grid step's input tile is one contiguous HBM region.
    xflat = x.reshape(NC, H, W)
    xpad = jnp.pad(xflat, ((0, NCp - NC), (ph, Hpp - H - ph), (pw, Wpp - W - pw)))
    xph = jnp.transpose(xpad.reshape(G, TC, Hb, sh, Wb, sw), (0, 3, 5, 2, 4, 1))

    kern = functools.partial(_avgpool2d_kernel, kh=kh, kw=kw, sh=sh, sw=sw,
                             out_h=out_h, out_w=out_w)

    in_tile_bytes = sh * sw * Hb * Wb * TC * itemsize
    out_tile_bytes = out_h * out_w * TC * itemsize
    acc_bytes = out_h * out_w * TC * 4
    needed = 2 * (in_tile_bytes + out_tile_bytes) + acc_bytes + (4 << 20)
    vmem_limit = max(32 << 20, int(needed * 1.25))
    vmem_limit = min(vmem_limit, int(vmem_cap * 0.9))

    cost = pl.CostEstimate(
        flops=kh * kw * out_h * out_w * NCp,
        transcendentals=0,
        bytes_accessed=(sh * sw * Hb * Wb + out_h * out_w) * NCp * itemsize,
    )

    out = pl.pallas_call(
        kern,
        out_shape=jax.ShapeDtypeStruct((G, out_h, out_w, TC), x.dtype),
        grid=grid,
        in_specs=[pl.BlockSpec((None, sh, sw, Hb, Wb, TC),
                               lambda c: (c, 0, 0, 0, 0, 0))],
        out_specs=pl.BlockSpec((None, out_h, out_w, TC),
                               lambda c: (c, 0, 0, 0)),
        compiler_params=pltpu.CompilerParams(
            dimension_semantics=("parallel",),
            vmem_limit_bytes=vmem_limit),
        cost_estimate=cost,
    )(xph)

    # Single output transpose back to NCHW (module semantics require NCHW;
    # a channels-last consumer could skip this entirely).
    out = jnp.transpose(out, (0, 3, 1, 2)).reshape(NCp, out_h, out_w)[:NC]
    return out.reshape(N, C, out_h, out_w)


class TransLayerRule3AvgPool2dPallas:
    """Mirror of TransLayer_rule3_AvgPool2d for an AvgPool2d layer.

    forward(x): x.unsqueeze(2) -> AvgPool3d((1,k,k),(1,s,s),(0,p,p)) -> squeeze(2)
    which is exactly AvgPool2d(k, s, p) applied to NCHW x (the size-1 depth axis
    with kernel/stride 1 and padding 0 is a no-op).
    """

    def __init__(self, kernel_size, stride=None, padding=0):
        self.kernel_size = kernel_size
        self.stride = stride
        self.padding = padding
        # AvgPool has no learnable parameters.

    def __call__(self, x):
        return avg_pool2d_pallas(x, self.kernel_size, self.stride, self.padding)


def _ref_avgpool2d(x, k, s, p):
    kh, kw = _pair(k); sh, sw = _pair(s); ph, pw = _pair(p)
    xs = jnp.pad(x, ((0, 0), (0, 0), (ph, ph), (pw, pw)))
    summed = jax.lax.reduce_window(xs, jnp.float32(0), jax.lax.add,
                                   (1, 1, kh, kw), (1, 1, sh, sw), "VALID")
    return summed / float(kh * kw)


if __name__ == "__main__":
    key = jax.random.PRNGKey(0)
    N, C, H, W = 2, 4, 16, 16
    x = jax.random.normal(key, (N, C, H, W), dtype=jnp.float32)

    # Case 1: k=2, s=2, p=0 (non-overlapping windows)
    layer = TransLayerRule3AvgPool2dPallas(kernel_size=2, stride=2, padding=0)
    y = jax.block_until_ready(layer(x))
    y_ref = x.reshape(N, C, H // 2, 2, W // 2, 2).mean(axis=(3, 5))
    assert y.shape == (N, C, H // 2, W // 2)
    assert jnp.allclose(y, y_ref, atol=1e-5, rtol=1e-5), "mismatch (k=2,s=2,p=0)"

    # Case 2: k=3, s=2, p=1 (overlapping windows + zero padding)
    layer2 = TransLayerRule3AvgPool2dPallas(kernel_size=3, stride=2, padding=1)
    y2 = jax.block_until_ready(layer2(x))
    y2_ref = _ref_avgpool2d(x, 3, 2, 1)
    assert y2.shape == y2_ref.shape == (N, C, 8, 8)
    assert jnp.allclose(y2, y2_ref, atol=1e-5, rtol=1e-5), "mismatch (k=3,s=2,p=1)"

    print("KERNEL_OK")
</pallas_src>

<mosaic_0001>
module attributes {stable_mosaic.version = 11 : i64} {
  func.func @_avgpool2d_kernel(%arg0: i32, %arg1: memref<1x2x2x8x8x128xf32, #tpu.memory_space<vmem>>, %arg2: memref<1x8x8x128xf32, #tpu.memory_space<vmem>>) attributes {dimension_semantics = [#tpu.dimension_semantics<parallel>], iteration_bounds = array<i64: 1>, scalar_prefetch = 0 : i64, scratch_operands = 0 : i64, tpu.core_type = #tpu.core_type<tc>, window_params = [{transform_indices = @transform_0, window_bounds = array<i64: 1, 2, 2, 8, 8, 128>}, {transform_indices = @transform_1, window_bounds = array<i64: 1, 8, 8, 128>}]} {
    %c0 = arith.constant 0 : index
    %c0_0 = arith.constant 0 : index
    %c0_1 = arith.constant 0 : index
    %c0_2 = arith.constant 0 : index
    %c0_3 = arith.constant 0 : index
    %c0_4 = arith.constant 0 : index
    %0 = vector.load %arg1[%c0, %c0_0, %c0_1, %c0_2, %c0_3, %c0_4] : memref<1x2x2x8x8x128xf32, #tpu.memory_space<vmem>>, vector<1x1x1x8x8x128xf32>
    %1 = vector.shape_cast %0 : vector<1x1x1x8x8x128xf32> to vector<8x8x128xf32>
    %c0_5 = arith.constant 0 : index
    %c0_6 = arith.constant 0 : index
    %c1 = arith.constant 1 : index
    %c0_7 = arith.constant 0 : index
    %c0_8 = arith.constant 0 : index
    %c0_9 = arith.constant 0 : index
    %2 = vector.load %arg1[%c0_5, %c0_6, %c1, %c0_7, %c0_8, %c0_9] : memref<1x2x2x8x8x128xf32, #tpu.memory_space<vmem>>, vector<1x1x1x8x8x128xf32>
    %3 = vector.shape_cast %2 : vector<1x1x1x8x8x128xf32> to vector<8x8x128xf32>
    %c0_10 = arith.constant 0 : index
    %c1_11 = arith.constant 1 : index
    %c0_12 = arith.constant 0 : index
    %c0_13 = arith.constant 0 : index
    %c0_14 = arith.constant 0 : index
    %c0_15 = arith.constant 0 : index
    %4 = vector.load %arg1[%c0_10, %c1_11, %c0_12, %c0_13, %c0_14, %c0_15] : memref<1x2x2x8x8x128xf32, #tpu.memory_space<vmem>>, vector<1x1x1x8x8x128xf32>
    %5 = vector.shape_cast %4 : vector<1x1x1x8x8x128xf32> to vector<8x8x128xf32>
    %c0_16 = arith.constant 0 : index
    %c1_17 = arith.constant 1 : index
    %c1_18 = arith.constant 1 : index
    %c0_19 = arith.constant 0 : index
    %c0_20 = arith.constant 0 : index
    %c0_21 = arith.constant 0 : index
    %6 = vector.load %arg1[%c0_16, %c1_17, %c1_18, %c0_19, %c0_20, %c0_21] : memref<1x2x2x8x8x128xf32, #tpu.memory_space<vmem>>, vector<1x1x1x8x8x128xf32>
    %7 = vector.shape_cast %6 : vector<1x1x1x8x8x128xf32> to vector<8x8x128xf32>
    %8 = arith.addf %1, %3 : vector<8x8x128xf32>
    %9 = arith.addf %5, %7 : vector<8x8x128xf32>
    %10 = arith.addf %8, %9 : vector<8x8x128xf32>
    %cst = arith.constant 2.500000e-01 : f32
    %11 = vector.broadcast %cst : f32 to vector<8x8x128xf32>
    %12 = arith.mulf %10, %11 : vector<8x8x128xf32>
    %c0_22 = arith.constant 0 : index
    %c0_23 = arith.constant 0 : index
    %c0_24 = arith.constant 0 : index
    %c0_25 = arith.constant 0 : index
    %13 = vector.load %arg2[%c0_22, %c0_23, %c0_24, %c0_25] : memref<1x8x8x128xf32, #tpu.memory_space<vmem>>, vector<1x8x8x128xf32>
    %14 = vector.shape_cast %13 : vector<1x8x8x128xf32> to vector<8x8x128xf32>
    %15 = vector.shape_cast %12 : vector<8x8x128xf32> to vector<1x8x8x128xf32>
    tpu.vector_store %arg2[%c0_22, %c0_23, %c0_24, %c0_25], %15 {strides = array<i32>} : memref<1x8x8x128xf32, #tpu.memory_space<vmem>>, vector<1x8x8x128xf32>,
    return
  }
  func.func @transform_0(%arg0: i32) -> (i32, i32, i32, i32, i32, i32) {
    %c0_i32 = arith.constant 0 : i32
    %c0_i32_0 = arith.constant 0 : i32
    %c0_i32_1 = arith.constant 0 : i32
    %c0_i32_2 = arith.constant 0 : i32
    %c0_i32_3 = arith.constant 0 : i32
    %c0_i32_4 = arith.constant 0 : i32
    return %arg0, %c0_i32, %c0_i32_0, %c0_i32_1, %c0_i32_2, %c0_i32_3 : i32, i32, i32, i32, i32, i32
  }
  func.func @transform_1(%arg0: i32) -> (i32, i32, i32, i32) {
    %c0_i32 = arith.constant 0 : i32
    %c0_i32_0 = arith.constant 0 : i32
    %c0_i32_1 = arith.constant 0 : i32
    %c0_i32_2 = arith.constant 0 : i32
    return %arg0, %c0_i32, %c0_i32_0, %c0_i32_1 : i32, i32, i32, i32
  }
}

</mosaic_0001>

<bundles_post_ra>
// kernel: tpu_custom_call.1
= control target key start
LH: loop header
LB: loop body
LE: loop exit
PB: predicated region body
PF: predicated region fallthrough
CT: control target
= control target key end

     0   :  { %6 = vsyncpa [#allocation3], 0  ;;  %s211_s0 = inlined_call_operand.hbm [shape: f32[1,2,2,8,8,128], index: 0, kind: input, shape index: {}]   ;;  %s212_s1 = inlined_call_operand.hbm [shape: f32[1,8,8,128], index: 1, kind: output, shape index: {}]  }
   0x1   :  { %7 = vsyncpa [#allocation4], 0  ;;  %s167_s6 = smov [#allocation2]   ;;  %s119_s10 = scalar_lea.hbm %s211_s0, 4096 }
   0x2   :  { %s13_s7 = sshll.u32 %s167_s6, 4  ;;  %p120_p0 = scmp.ne.s32.totalorder %s211_s0, %s119_s10  ;;  %s14_s7 = int_to_ptr.vmem [resolvable:$true] %s13_s7 }
   0x3   :  { %p123_p1 = scmp.lt.u32.totalorder %s119_s10, %s211_s0 }
   0x5   :  { %p125_p2 = pnand %p123_p1, %p120_p0 }
   0x7   :  { %128 = shalt.err (!%p125_p2)
}
   0x8   :  { %s129_s15 = scalar_lea.vmem %s14_s7, 4096  ;;  %p134_p4 = scmp.lt.s32.totalorder %s14_s7, %s14_s7 }
   0x9   :  { %p130_p3 = scmp.ne.s32.totalorder %s14_s7, %s129_s15  ;;  %p135_p5 = scmp.lt.s32.totalorder %s129_s15, %s129_s15 }
   0xb   :  { %p136_p6 = por %p135_p5, %p134_p4 }
   0xd   :  { %p137_p7 = pnand %p136_p6, %p130_p3 }
   0xf   :  { %140 = shalt.err (!%p137_p7)
}
  0x10   :  { %s168_s16 = smov 128   ;;  %s169_s17 = smov 8  }
  0x11   :  { %19 = dma.hbm_to_vmem [thread:$0]  %s211_s0, 4096, %s14_s7, [#allocation3], %s168_s16, %s168_s16, %s169_s17  }
  0x12   :  { %163 = dma.done.wait [#allocation3], 4096  }
  0x13   :  { %164 = vsyncadd [#allocation3], 4294963200  ;;  %v23_v0 = vld [vmem:[#allocation2] sm:$0xff]  ;;  %v24_v5 = vld [vmem:[#allocation2 + $0x8] sm:$0xff]  ;;  %s170_s0 = smov [#allocation5]  }
  0x14   :  { %v32_v1 = vld [vmem:[#allocation2 + $0x40] sm:$0xff]  ;;  %v33_v6 = vld [vmem:[#allocation2 + $0x48] sm:$0xff]  ;;  %v25_v11 = vld [vmem:[#allocation2 + $0x10] sm:$0xff]  ;;  %s103_s20 = sshll.u32 %s170_s0, 4  ;;  %s104_s20 = int_to_ptr.vmem [resolvable:$true] %s103_s20 }
  0x15   :  { %v41_v2 = vld [vmem:[#allocation2 + $0x80] sm:$0xff]  ;;  %v58_v4 = vadd.f32 %v32_v1, %v23_v0  ;;  %v42_v8 = vld [vmem:[#allocation2 + $0x88] sm:$0xff]  ;;  %v59_v10 = vadd.f32 %v33_v6, %v24_v5  ;;  %v34_v13 = vld [vmem:[#allocation2 + $0x50] sm:$0xff]  ;;  %s141_s21 = scalar_lea.vmem %s104_s20, 1024  ;;  %p146_p9 = scmp.lt.s32.totalorder %s104_s20, %s104_s20 }
  0x16   :  { %v50_v3 = vld [vmem:[#allocation2 + $0xc0] sm:$0xff]  ;;  %v51_v9 = vld [vmem:[#allocation2 + $0xc8] sm:$0xff]  ;;  %v43_v14 = vld [vmem:[#allocation2 + $0x90] sm:$0xff]  ;;  %v60_v17 = vadd.f32 %v34_v13, %v25_v11  ;;  %p142_p8 = scmp.ne.s32.totalorder %s104_s20, %s141_s21  ;;  %p147_p10 = scmp.lt.s32.totalorder %s141_s21, %s141_s21 }
  0x17   :  { %v66_v7 = vadd.f32 %v50_v3, %v41_v2  ;;  %v67_v12 = vadd.f32 %v51_v9, %v42_v8  ;;  %v52_v15 = vld [vmem:[#allocation2 + $0xd0] sm:$0xff]  ;;  %v26_v19 = vld [vmem:[#allocation2 + $0x18] sm:$0xff]  ;;  %v27_v25 = vld [vmem:[#allocation2 + $0x20] sm:$0xff] }
  0x18   :  { %v68_v18 = vadd.f32 %v52_v15, %v43_v14  ;;  %v35_v20 = vld [vmem:[#allocation2 + $0x58] sm:$0xff]  ;;  %v36_v26 = vld [vmem:[#allocation2 + $0x60] sm:$0xff]  ;;  %v28_v33 = vld [vmem:[#allocation2 + $0x28] sm:$0xff]  ;;  %p148_p11 = por %p147_p10, %p146_p9 }
  0x19   :  { %v74_v16 = vadd.f32 %v66_v7, %v58_v4  ;;  %v44_v21 = vld [vmem:[#allocation2 + $0x98] sm:$0xff]  ;;  %v75_v22 = vadd.f32 %v67_v12, %v59_v10  ;;  %v61_v24 = vadd.f32 %v35_v20, %v26_v19  ;;  %v45_v30 = vld [vmem:[#allocation2 + $0xa0] sm:$0xff]  ;;  %v62_v32 = vadd.f32 %v36_v26, %v27_v25  ;;  %v37_v36 = vld [vmem:[#allocation2 + $0x68] sm:$0xff] }
  0x1a   :  { %v53_v23 = vld [vmem:[#allocation2 + $0xd8] sm:$0xff]  ;;  %v76_v28 = vadd.f32 %v68_v18, %v60_v17  ;;  %v54_v31 = vld [vmem:[#allocation2 + $0xe0] sm:$0xff]  ;;  %v46_v37 = vld [vmem:[#allocation2 + $0xa8] sm:$0xff]  ;;  %v63_v41 = vadd.f32 %v37_v36, %v28_v33  ;;  %p149_p12 = pnand %p148_p11, %p142_p8 }
  0x1b   :  { %v82_v27 = vmul.f32 0.25, %v74_v16  ;;  %v69_v29 = vadd.f32 %v53_v23, %v44_v21  ;;  %v83_v34 = vmul.f32 0.25, %v75_v22  ;;  %v70_v35 = vadd.f32 %v54_v31, %v45_v30  ;;  %v55_v38 = vld [vmem:[#allocation2 + $0xe8] sm:$0xff]  ;;  %v29_v43 = vld [vmem:[#allocation2 + $0x30] sm:$0xff]  ;;  %v30_v49 = vld [vmem:[#allocation2 + $0x38] sm:$0xff] }
  0x1c   :  { %v84_v39 = vmul.f32 0.25, %v76_v28  ;;  %v71_v42 = vadd.f32 %v55_v38, %v46_v37  ;;  %v38_v44 = vld [vmem:[#allocation2 + $0x70] sm:$0xff]  ;;  %v39_v50 = vld [vmem:[#allocation2 + $0x78] sm:$0xff] }
  0x1d   :  { %90 = vst [vmem:[#allocation5] sm:$0xff] %v82_v27  ;;  %v77_v40 = vadd.f32 %v69_v29, %v61_v24  ;;  %v47_v45 = vld [vmem:[#allocation2 + $0xb0] sm:$0xff]  ;;  %91 = vst [vmem:[#allocation5 + $0x8] sm:$0xff] %v83_v34  ;;  %v78_v46 = vadd.f32 %v70_v35, %v62_v32  ;;  %v64_v48 = vadd.f32 %v38_v44, %v29_v43  ;;  %v48_v54 = vld [vmem:[#allocation2 + $0xb8] sm:$0xff] }
  0x1e   :  { %v56_v47 = vld [vmem:[#allocation2 + $0xf0] sm:$0xff]  ;;  %92 = vst [vmem:[#allocation5 + $0x10] sm:$0xff] %v84_v39  ;;  %v79_v52 = vadd.f32 %v71_v42, %v63_v41  ;;  %v57_v55 = vld [vmem:[#allocation2 + $0xf8] sm:$0xff]  ;;  %v65_v56 = vadd.f32 %v39_v50, %v30_v49 }
  0x1f   :  { %v85_v51 = vmul.f32 0.25, %v77_v40  ;;  %v72_v53 = vadd.f32 %v56_v47, %v47_v45  ;;  %v86_v57 = vmul.f32 0.25, %v78_v46  ;;  %v73_v58 = vadd.f32 %v57_v55, %v48_v54 }
  0x20   :  { %v87_v59 = vmul.f32 0.25, %v79_v52 }
  0x21   :  { %93 = vst [vmem:[#allocation5 + $0x18] sm:$0xff] %v85_v51  ;;  %v80_v60 = vadd.f32 %v72_v53, %v64_v48  ;;  %94 = vst [vmem:[#allocation5 + $0x20] sm:$0xff] %v86_v57  ;;  %v81_v61 = vadd.f32 %v73_v58, %v65_v56 }
  0x22   :  { %95 = vst [vmem:[#allocation5 + $0x28] sm:$0xff] %v87_v59 }
  0x23   :  { %v88_v62 = vmul.f32 0.25, %v80_v60  ;;  %v89_v63 = vmul.f32 0.25, %v81_v61 }
  0x25   :  { %96 = vst [vmem:[#allocation5 + $0x30] sm:$0xff] %v88_v62  ;;  %97 = vst [vmem:[#allocation5 + $0x38] sm:$0xff] %v89_v63 }
  0x26   :  { %152 = shalt.err (!%p149_p12)
}
  0x27   :  { %s153_s24 = scalar_lea.hbm %s212_s1, 1024 }
  0x28   :  { %p154_p13 = scmp.ne.s32.totalorder %s212_s1, %s153_s24  ;;  %p157_p0 = scmp.lt.u32.totalorder %s153_s24, %s212_s1 }
  0x2a   :  { %p159_p1 = pnand %p157_p0, %p154_p13 }
  0x2c   :  { %162 = shalt.err (!%p159_p1)
}
  0x2d   :  { %109 = dma.vmem_to_hbm [thread:$0]  %s104_s20, 1024, %s212_s1, [#allocation4], %s168_s16, %s168_s16, %s169_s17  }
  0x2e   :  { %165 = dma.done.wait [#allocation4], 1024  }
  0x2f   :  { %166 = vsyncadd [#allocation4], 4294966272 }
  0x30   :  { %113 = vsyncpa [#allocation3], 1 }
  0x31   :  { %114 = vsyncpa [#allocation4], 1 }

</bundles_post_ra>
